<compile_context>
chip_gen: v6e
topology: v6e:2x2x1
jax: 0.10.0
libtpu: 0.0.40
codegen_flags: <defaults>
</compile_context>

<pallas_src>
import functools
import math

import jax
import jax.numpy as jnp
from jax.experimental import pallas as pl
from jax.experimental.pallas import tpu as pltpu


def _pick_tile(dim, pref):
    """Use `pref` if it evenly tiles `dim`, otherwise fall back to full dim."""
    if pref is not None and dim >= pref and dim % pref == 0:
        return pref
    return dim


# ---------------------------------------------------------------------------
# Tiled matmul for the projections (weights streamed, K-axis reduction).
# ---------------------------------------------------------------------------
def _matmul_kernel(x_ref, w_ref, o_ref, acc_ref):
    @pl.when(pl.program_id(2) == 0)
    def _():
        acc_ref[...] = jnp.zeros_like(acc_ref)

    acc_ref[...] += jnp.dot(x_ref[...], w_ref[...],
                            preferred_element_type=jnp.float32)

    @pl.when(pl.program_id(2) == pl.num_programs(2) - 1)
    def _():
        o_ref[...] = acc_ref[...].astype(o_ref.dtype)


def _matmul(x, w, *, tm=256, tn=256, tk=512):
    M, K = x.shape
    K2, N = w.shape
    assert K == K2
    tm, tn, tk = _pick_tile(M, tm), _pick_tile(N, tn), _pick_tile(K, tk)
    return pl.pallas_call(
        _matmul_kernel,
        out_shape=jax.ShapeDtypeStruct((M, N), x.dtype),
        grid=(M // tm, N // tn, K // tk),
        in_specs=[
            pl.BlockSpec((tm, tk), lambda i, j, k: (i, k)),
            pl.BlockSpec((tk, tn), lambda i, j, k: (k, j)),
        ],
        out_specs=pl.BlockSpec((tm, tn), lambda i, j, k: (i, j)),
        scratch_shapes=[pltpu.VMEM((tm, tn), jnp.float32)],
        compiler_params=pltpu.CompilerParams(
            dimension_semantics=("parallel", "parallel", "arbitrary"),
            vmem_limit_bytes=48 * 1024 * 1024),
    )(x, w)


# ---------------------------------------------------------------------------
# Flash-style attention: grid = (B, H, q_tiles, kv_tiles), online softmax.
# ---------------------------------------------------------------------------
def _flash_kernel(q_ref, k_ref, v_ref, o_ref, m_sc, l_sc, acc_sc, *,
                  scale, causal, tq, tkv, head_dim):
    qi = pl.program_id(2)
    ki = pl.program_id(3)
    nk = pl.num_programs(3)

    @pl.when(ki == 0)
    def _():
        m_sc[...] = jnp.full((tq, 1), -jnp.inf, jnp.float32)
        l_sc[...] = jnp.zeros((tq, 1), jnp.float32)
        acc_sc[...] = jnp.zeros((tq, head_dim), jnp.float32)

    def _step():
        q = q_ref[0, 0] * scale                                # (tq, Dh), scale folded in
        k = k_ref[0, 0]                                        # (tkv, Dh)
        v = v_ref[0, 0]                                        # (tkv, Dh)
        # q @ k^T without an XLU transpose: contract Dh of q against Dh of k.
        s = jax.lax.dot_general(q, k, (((1,), (1,)), ((), ())),
                                preferred_element_type=jnp.float32)  # (tq, tkv)
        if causal:
            row = qi * tq + jax.lax.broadcasted_iota(jnp.int32, (tq, tkv), 0)
            col = ki * tkv + jax.lax.broadcasted_iota(jnp.int32, (tq, tkv), 1)
            s = jnp.where(col <= row, s, -jnp.inf)

        m_prev = m_sc[...]
        m_new = jnp.maximum(m_prev, jnp.max(s, axis=-1, keepdims=True))
        alpha = jnp.exp(m_prev - m_new)
        p = jnp.exp(s - m_new)
        l_sc[...] = alpha * l_sc[...] + jnp.sum(p, axis=-1, keepdims=True)
        acc_sc[...] = alpha * acc_sc[...] + jax.lax.dot_general(
            p, v, (((1,), (0,)), ((), ())), preferred_element_type=jnp.float32)
        m_sc[...] = m_new

    if causal:
        # Skip kv tiles lying entirely above the diagonal of this q tile.
        @pl.when(ki * tkv <= qi * tq + (tq - 1))
        def _():
            _step()
    else:
        _step()

    @pl.when(ki == nk - 1)
    def _():
        inv_l = pl.reciprocal(l_sc[...], approx=False)
        o_ref[0, 0] = (acc_sc[...] * inv_l).astype(o_ref.dtype)


def _flash_attention(q, k, v, *, causal, tq=None, tkv=None):
    B, H, S, Dh = q.shape
    scale = 1.0 / math.sqrt(Dh)
    tq = _pick_tile(S, 128 if tq is None else tq)
    tkv = _pick_tile(S, 128 if tkv is None else tkv)
    kernel = functools.partial(_flash_kernel, scale=scale, causal=causal,
                               tq=tq, tkv=tkv, head_dim=Dh)
    return pl.pallas_call(
        kernel,
        out_shape=jax.ShapeDtypeStruct((B, H, S, Dh), q.dtype),
        grid=(B, H, S // tq, S // tkv),
        in_specs=[
            pl.BlockSpec((1, 1, tq, Dh), lambda b, h, qi, ki: (b, h, qi, 0)),
            pl.BlockSpec((1, 1, tkv, Dh), lambda b, h, qi, ki: (b, h, ki, 0)),
            pl.BlockSpec((1, 1, tkv, Dh), lambda b, h, qi, ki: (b, h, ki, 0)),
        ],
        out_specs=pl.BlockSpec((1, 1, tq, Dh), lambda b, h, qi, ki: (b, h, qi, 0)),
        scratch_shapes=[
            pltpu.VMEM((tq, 1), jnp.float32),      # running max  m
            pltpu.VMEM((tq, 1), jnp.float32),      # running sum  l
            pltpu.VMEM((tq, Dh), jnp.float32),     # output accumulator
        ],
        compiler_params=pltpu.CompilerParams(
            dimension_semantics=("parallel", "parallel", "parallel", "arbitrary"),
            vmem_limit_bytes=48 * 1024 * 1024),
    )(q, k, v)


# ---------------------------------------------------------------------------
# Full forward pass.
# ---------------------------------------------------------------------------
def mhsa_forward(x, in_proj_w, out_proj_w, *, heads, causal=False,
                 tq=None, tkv=None):
    """x: (B,S,D). in_proj_w: (3D,D) torch layout. out_proj_w: (D,D) torch layout."""
    B, S, D = x.shape
    assert D % heads == 0
    Dh = D // heads

    # QKV in-projection (tiled matmul, weights streamed).
    qkv = _matmul(x.reshape(B * S, D), in_proj_w.T)            # (B*S, 3D)

    # chunk(3) + unflatten(H, Dh) + swapaxes -> (3, B, H, S, Dh). Pure layout,
    # handled by XLA outside the kernels.
    qkv = qkv.reshape(B, S, 3, heads, Dh).transpose(2, 0, 3, 1, 4)
    q, k, v = qkv[0], qkv[1], qkv[2]

    # Flash attention over (B, H, q-tiles, kv-tiles).
    o = _flash_attention(q, k, v, causal=causal, tq=tq, tkv=tkv)  # (B,H,S,Dh)

    # permute + flatten heads, then out-projection (tiled matmul).
    o = o.transpose(0, 2, 1, 3).reshape(B * S, D)
    y = _matmul(o, out_proj_w.T)                                # (B*S, D)
    return y.reshape(B, S, D)


# ---------------------------------------------------------------------------
# Reference + test harness.
# ---------------------------------------------------------------------------
def _xavier_uniform(key, shape):
    fan_out, fan_in = shape
    a = math.sqrt(6.0 / (fan_in + fan_out))
    return jax.random.uniform(key, shape, jnp.float32, minval=-a, maxval=a)


def _reference(x, in_proj_w, out_proj_w, heads, causal=False):
    B, S, D = x.shape
    Dh = D // heads
    qkv = jnp.einsum('bsd,ed->bse', x, in_proj_w)               # (B, S, 3D)
    q, k, v = jnp.split(qkv, 3, axis=-1)

    def to_heads(t):
        return t.reshape(B, S, heads, Dh).transpose(0, 2, 1, 3)

    q, k, v = to_heads(q), to_heads(k), to_heads(v)
    s = jnp.einsum('bhqd,bhkd->bhqk', q, k) / math.sqrt(Dh)
    if causal:
        mask = jnp.tril(jnp.ones((S, S), bool))
        s = jnp.where(mask, s, -jnp.inf)
    p = jax.nn.softmax(s, axis=-1)
    o = jnp.einsum('bhqk,bhkd->bhqd', p, v)
    o = o.transpose(0, 2, 1, 3).reshape(B, S, D)
    return jnp.einsum('bsd,ed->bse', o, out_proj_w)


if __name__ == "__main__":
    B, S, D, H = 2, 16, 32, 4
    key = jax.random.PRNGKey(0)
    kx, kw1, kw2 = jax.random.split(key, 3)

    x = jax.random.normal(kx, (B, S, D), jnp.float32)
    in_proj_w = _xavier_uniform(kw1, (3 * D, D))                # torch (out,in) layout
    bound = 1.0 / math.sqrt(D)
    out_proj_w = jax.random.uniform(kw2, (D, D), jnp.float32, -bound, bound)

    ok = True
    for causal in (False, True):
        # tq/tkv = 8 so that the small test exercises multiple q/kv tiles and
        # the online-softmax accumulation + causal tile-skip paths.
        y = mhsa_forward(x, in_proj_w, out_proj_w, heads=H, causal=causal,
                         tq=8, tkv=8)
        y = jax.block_until_ready(y)
        y_ref = _reference(x, in_proj_w, out_proj_w, H, causal=causal)
        ok = ok and (y.shape == (B, S, D))
        ok = ok and bool(jnp.allclose(y, y_ref, atol=1e-4, rtol=1e-4))

    assert ok, "mismatch vs reference"
    print("KERNEL_OK")
</pallas_src>

<mosaic_0001>
module attributes {stable_mosaic.version = 11 : i64} {
  func.func @_matmul_kernel(%arg0: i32, %arg1: i32, %arg2: i32, %arg3: memref<32x32xf32, #tpu.memory_space<vmem>>, %arg4: memref<32x96xf32, #tpu.memory_space<vmem>>, %arg5: memref<32x96xf32, #tpu.memory_space<vmem>>, %arg6: memref<32x96xf32, #tpu.memory_space<vmem>>) attributes {dimension_semantics = [#tpu.dimension_semantics<parallel>, #tpu.dimension_semantics<parallel>, #tpu.dimension_semantics<arbitrary>], iteration_bounds = array<i64: 1, 1, 1>, scalar_prefetch = 0 : i64, scratch_operands = 1 : i64, tpu.core_type = #tpu.core_type<tc>, window_params = [{transform_indices = @transform_0, window_bounds = array<i64: 32, 32>}, {transform_indices = @transform_1, window_bounds = array<i64: 32, 96>}, {transform_indices = @transform_2, window_bounds = array<i64: 32, 96>}]} {
    %c0_i32 = arith.constant 0 : i32
    %0 = arith.cmpi eq, %arg2, %c0_i32 : i32
    %1 = arith.extui %0 : i1 to i32
    %c0_i32_0 = arith.constant 0 : i32
    %2 = arith.cmpi ne, %1, %c0_i32_0 : i32
    scf.if %2 {
      %cst_10 = arith.constant 0.000000e+00 : f32
      %12 = vector.broadcast %cst_10 : f32 to vector<32x96xf32>
      %c0_11 = arith.constant 0 : index
      %c0_12 = arith.constant 0 : index
      %13 = vector.load %arg6[%c0_11, %c0_12] : memref<32x96xf32, #tpu.memory_space<vmem>>, vector<32x96xf32>
      tpu.vector_store %arg6[%c0_11, %c0_12], %12 {strides = array<i32>} : memref<32x96xf32, #tpu.memory_space<vmem>>, vector<32x96xf32>,
    } else {
    }
    %c0 = arith.constant 0 : index
    %c0_1 = arith.constant 0 : index
    %3 = vector.load %arg6[%c0, %c0_1] : memref<32x96xf32, #tpu.memory_space<vmem>>, vector<32x96xf32>
    %c0_2 = arith.constant 0 : index
    %c0_3 = arith.constant 0 : index
    %4 = vector.load %arg3[%c0_2, %c0_3] : memref<32x32xf32, #tpu.memory_space<vmem>>, vector<32x32xf32>
    %c0_4 = arith.constant 0 : index
    %c0_5 = arith.constant 0 : index
    %5 = vector.load %arg4[%c0_4, %c0_5] : memref<32x96xf32, #tpu.memory_space<vmem>>, vector<32x96xf32>
    %cst = arith.constant dense<0.000000e+00> : vector<32x96xf32>
    %6 = tpu.matmul %4, %5, %cst {dimension_numbers = #tpu.dot_dimension_numbers<[1], [0], [0], [1], [0, 0, 1, 1], [], []>} : vector<32x32xf32>, vector<32x96xf32>, vector<32x96xf32> -> vector<32x96xf32>
    %7 = arith.addf %3, %6 : vector<32x96xf32>
    %c0_6 = arith.constant 0 : index
    %c0_7 = arith.constant 0 : index
    %8 = vector.load %arg6[%c0_6, %c0_7] : memref<32x96xf32, #tpu.memory_space<vmem>>, vector<32x96xf32>
    tpu.vector_store %arg6[%c0_6, %c0_7], %7 {strides = array<i32>} : memref<32x96xf32, #tpu.memory_space<vmem>>, vector<32x96xf32>,
    %c0_i32_8 = arith.constant 0 : i32
    %9 = arith.cmpi eq, %arg2, %c0_i32_8 : i32
    %10 = arith.extui %9 : i1 to i32
    %c0_i32_9 = arith.constant 0 : i32
    %11 = arith.cmpi ne, %10, %c0_i32_9 : i32
    scf.if %11 {
      %c0_10 = arith.constant 0 : index
      %c0_11 = arith.constant 0 : index
      %12 = vector.load %arg6[%c0_10, %c0_11] : memref<32x96xf32, #tpu.memory_space<vmem>>, vector<32x96xf32>
      %c0_12 = arith.constant 0 : index
      %c0_13 = arith.constant 0 : index
      %13 = vector.load %arg5[%c0_12, %c0_13] : memref<32x96xf32, #tpu.memory_space<vmem>>, vector<32x96xf32>
      tpu.vector_store %arg5[%c0_12, %c0_13], %12 {strides = array<i32>} : memref<32x96xf32, #tpu.memory_space<vmem>>, vector<32x96xf32>,
    } else {
    }
    return
  }
  func.func @transform_0(%arg0: i32, %arg1: i32, %arg2: i32) -> (i32, i32) {
    %c0_i32 = arith.constant 0 : i32
    return %arg0, %arg2 : i32, i32
  }
  func.func @transform_1(%arg0: i32, %arg1: i32, %arg2: i32) -> (i32, i32) {
    %c0_i32 = arith.constant 0 : i32
    return %arg2, %arg1 : i32, i32
  }
  func.func @transform_2(%arg0: i32, %arg1: i32, %arg2: i32) -> (i32, i32) {
    %c0_i32 = arith.constant 0 : i32
    return %arg0, %arg1 : i32, i32
  }
}

</mosaic_0001>

<bundles_post_ra>
// kernel: tpu_custom_call.1
= control target key start
LH: loop header
LB: loop body
LE: loop exit
PB: predicated region body
PF: predicated region fallthrough
CT: control target
= control target key end

     0   :  { %7 = vsyncpa [#allocation4], 0  ;;  %s354_s0 = inlined_call_operand.hbm [shape: f32[32,32], index: 0, kind: input, shape index: {}]   ;;  %s355_s1 = inlined_call_operand.hbm [shape: f32[32,96], index: 1, kind: input, shape index: {}]   ;;  %s356_s2 = inlined_call_operand.hbm [shape: f32[32,96], index: 2, kind: output, shape index: {}]  }
   0x1   :  { %8 = vsyncpa [#allocation7], 0 }
   0x2   :  { %9 = vsyncpa [#allocation5], 0  ;;  %s303_s9 = smov [#allocation3]  }
   0x3   :  { %s15_s10 = sshll.u32 %s303_s9, 4  ;;  %s16_s10 = int_to_ptr.vmem [resolvable:$true] %s15_s10 }
   0x4   :  { %s245_s11 = scalar_lea.vmem %s16_s10, 512  ;;  %p250_p1 = scmp.lt.s32.totalorder %s16_s10, %s16_s10 }
   0x5   :  { %p246_p0 = scmp.ne.s32.totalorder %s16_s10, %s245_s11  ;;  %p251_p2 = scmp.lt.s32.totalorder %s245_s11, %s245_s11 }
   0x7   :  { %p252_p3 = por %p251_p2, %p250_p1 }
   0x9   :  { %p253_p4 = pnand %p252_p3, %p246_p0 }
   0xb   :  { %256 = shalt.err (!%p253_p4)
}
   0xc   :  { %s304_s12 = smov 128   ;;  %s305_s13 = smov 8  }
   0xd   :  { %21 = dma.hbm_to_vmem [thread:$0]  %s354_s0, 512, %s16_s10, [#allocation4], %s304_s12, %s304_s12, %s305_s13  }
   0xe   :  { %s306_s16 = smov [#allocation6]  }
   0xf   :  { %s27_s17 = sshll.u32 %s306_s16, 4  ;;  %s28_s17 = int_to_ptr.vmem [resolvable:$true] %s27_s17 }
  0x10   :  { %s265_s18 = scalar_lea.vmem %s28_s17, 512  ;;  %p270_p6 = scmp.lt.s32.totalorder %s28_s17, %s28_s17 }
  0x11   :  { %p266_p5 = scmp.ne.s32.totalorder %s28_s17, %s265_s18  ;;  %p271_p7 = scmp.lt.s32.totalorder %s265_s18, %s265_s18 }
  0x13   :  { %p272_p8 = por %p271_p7, %p270_p6 }
  0x15   :  { %p273_p9 = pnand %p272_p8, %p266_p5 }
  0x17   :  { %276 = shalt.err (!%p273_p9)
}
  0x18   :  { %33 = dma.hbm_to_vmem [thread:$0]  %s355_s1, 512, %s28_s17, [#allocation7], %s304_s12, %s304_s12, %s305_s13  }
  0x19   :  { %297 = dma.done.wait [#allocation4], 512  }
  0x1a   :  { %298 = vsyncadd [#allocation4], 4294966784 }
  0x1b   :  { %299 = dma.done.wait [#allocation7], 512  }
  0x1c   :  { %300 = vsyncadd [#allocation7], 4294966784  ;;  %vm44_vm0 = vcmask 785408   ;;  %v307_v0 = vmov 0.0   ;;  %v60_v1 = vld [vmem:[#allocation6 + $0x18] sm:$0xff]  ;;  %v59_v2 = vld [vmem:[#allocation6 + $0x10] sm:$0xff] }
  0x1d   :  { %46 = vst.msk [vmem:[#allocation2 + $0x8] sm:$0xff] %vm44_vm0, %v307_v0  ;;  %45 = vst.msk [vmem:[#allocation2] sm:$0xff] %vm44_vm0, %v307_v0  ;;  %209 = vmatprep.subr.mxu0 %v60_v1  ;;  %223 = vmatprep.subr.mxu1 %v60_v1  ;;  %v58_v3 = vld [vmem:[#allocation6 + $0x8] sm:$0xff]  ;;  %v57_v4 = vld [vmem:[#allocation6] sm:$0xff]  ;;  %vm61_vm1 = vcmask 261120   ;;  %s308_s0 = smov [#allocation8]  }
  0x1e   :  { %47 = vst.msk [vmem:[#allocation2 + $0x10] sm:$0xff] %vm44_vm0, %v307_v0  ;;  %48 = vst.msk [vmem:[#allocation2 + $0x18] sm:$0xff] %vm44_vm0, %v307_v0  ;;  %210 = vmatpush3.msra.mxu0 %v60_v1  ;;  %227 = vmatpush3.msra.mxu1 %v60_v1  ;;  %v53_v5 = vld [vmem:[#allocation3] sm:$0xff]  ;;  %v55_v6 = vld [vmem:[#allocation3 + $0x10] sm:$0xff]  ;;  %s184_s1 = sshll.u32 %s308_s0, 4  ;;  %s185_s1 = int_to_ptr.vmem [resolvable:$true] %s184_s1 }
  0x1f   :  { %211 = vmatprep.subr.mxu0 %v59_v2  ;;  %224 = vmatprep.subr.mxu1 %v59_v2  ;;  %v54_v7 = vld [vmem:[#allocation3 + $0x8] sm:$0xff]  ;;  %v56_v8 = vld [vmem:[#allocation3 + $0x18] sm:$0xff]  ;;  %s277_s21 = scalar_lea.vmem %s185_s1, 512  ;;  %p282_p11 = scmp.lt.s32.totalorder %s185_s1, %s185_s1 }
  0x20   :  { %212 = vmatpush3.msra.mxu0 %v59_v2  ;;  %228 = vmatpush3.msra.mxu1 %v59_v2  ;;  %p278_p10 = scmp.ne.s32.totalorder %s185_s1, %s277_s21  ;;  %p283_p12 = scmp.lt.s32.totalorder %s277_s21, %s277_s21 }
  0x21   :  { %213 = vmatprep.subr.mxu0 %v58_v3  ;;  %225 = vmatprep.subr.mxu1 %v58_v3 }
  0x22   :  { %214 = vmatpush3.msra.mxu0 %v58_v3  ;;  %229 = vmatpush3.msra.mxu1 %v58_v3  ;;  %p284_p13 = por %p283_p12, %p282_p11 }
  0x23   :  { %215 = vmatprep.subr.mxu0 %v57_v4  ;;  %226 = vmatprep.subr.mxu1 %v57_v4 }
  0x24   :  { %216 = vmatpush3.msra.mxu0 %v57_v4  ;;  %230 = vmatpush3.msra.mxu1 %v57_v4  ;;  %v50_v9 = vld [vmem:[#allocation2 + $0x8] sm:$0xff]  ;;  %v49_v13 = vld [vmem:[#allocation2] sm:$0xff]  ;;  %p285_p0 = pnand %p284_p13, %p278_p10 }
  0x25   :  { %217 = vmatprep.mubr.msk.f32.mxu0 %vm61_vm1, %v53_v5  ;;  %220 = vmatprep.mubr.msk.f32.mxu1 %vm61_vm1, %v55_v6  ;;  %v52_v10 = vld [vmem:[#allocation2 + $0x18] sm:$0xff]  ;;  %v51_v14 = vld [vmem:[#allocation2 + $0x10] sm:$0xff] }
  0x26   :  { %218 = vmatmul.mubr.msk.f32.vlgmr.msra.gmra.mxu0 %vm61_vm1, %v54_v7  ;;  %221 = vmatmul.mubr.msk.f32.vlgmr.msra.gmra.mxu1 %vm61_vm1, %v56_v8 }
  0xe6   :  { %v219_v11 = vpop.f32.mrf.mxu0  ;;  %v222_v12 = vpop.f32.mrf.mxu1 }
  0xe7   :  { %v160_v15 = vadd.f32 %v219_v11, %v50_v9  ;;  %v162_v16 = vadd.f32 %v222_v12, %v52_v10 }
  0xe8   :  { %v140_v17 = vpop.f32.mrf.mxu0  ;;  %v150_v18 = vpop.f32.mrf.mxu1 }
  0xe9   :  { %165 = vst.msk [vmem:[#allocation2 + $0x8] sm:$0xff] %vm44_vm0, %v160_v15  ;;  %167 = vst.msk [vmem:[#allocation2 + $0x18] sm:$0xff] %vm44_vm0, %v162_v16  ;;  %v159_v19 = vadd.f32 %v140_v17, %v49_v13  ;;  %v161_v20 = vadd.f32 %v150_v18, %v51_v14 }
  0xeb   :  { %164 = vst.msk [vmem:[#allocation2] sm:$0xff] %vm44_vm0, %v159_v19  ;;  %166 = vst.msk [vmem:[#allocation2 + $0x10] sm:$0xff] %vm44_vm0, %v161_v20 }
  0xf0   :  { %v172_v21 = vld [vmem:[#allocation2 + $0x8] sm:$0xff]  ;;  %v174_v22 = vld [vmem:[#allocation2 + $0x18] sm:$0xff] }
  0xf1   :  { %176 = vst.msk [vmem:[#allocation8 + $0x8] sm:$0xff] %vm44_vm0, %v172_v21  ;;  %178 = vst.msk [vmem:[#allocation8 + $0x18] sm:$0xff] %vm44_vm0, %v174_v22 }
  0xf2   :  { %v171_v23 = vld [vmem:[#allocation2] sm:$0xff]  ;;  %v173_v24 = vld [vmem:[#allocation2 + $0x10] sm:$0xff] }
  0xf3   :  { %175 = vst.msk [vmem:[#allocation8] sm:$0xff] %vm44_vm0, %v171_v23  ;;  %177 = vst.msk [vmem:[#allocation8 + $0x10] sm:$0xff] %vm44_vm0, %v173_v24 }
  0xf4   :  { %288 = shalt.err (!%p285_p0)
}
  0xf5   :  { %190 = dma.vmem_to_hbm [thread:$0]  %s185_s1, 512, %s356_s2, [#allocation5], %s304_s12, %s304_s12, %s305_s13  }
  0xf6   :  { %301 = dma.done.wait [#allocation5], 512  }
  0xf7   :  { %302 = vsyncadd [#allocation5], 4294966784 }
  0xf8   :  { %194 = vsyncpa [#allocation4], 1 }
  0xf9   :  { %195 = vsyncpa [#allocation7], 1 }
  0xfa   :  { %196 = vsyncpa [#allocation5], 1 }

</bundles_post_ra>
